<compile_context>
chip_gen: v7x
topology: tpu7x:2x2x1
jax: 0.10.0
libtpu: 0.0.40
codegen_flags: <defaults>
</compile_context>

<pallas_src>
import jax
import jax.numpy as jnp
from jax import lax
from jax.experimental import pallas as pl
from jax.experimental.pallas import tpu as pltpu

KH = KW = 7
PAD = 3
CIN_ALIGN = 16   # bf16 sublane packing: keeps the in-kernel K-concatenation tile-aligned


# ----------------------------- Pallas kernel ---------------------------------
def outconv_kernel(x_ref, w_ref, b_ref, o_ref):
    # x_ref: (1, Hp_tot, Cin_p, Wp)  reflection-padded image, bf16, (H, C, W) layout
    #                                (W on lanes, C on sublanes) -> channel-as-M matmuls
    # w_ref: (KH, Cout, KW*Cin_p)    conv weight, the 7 kx taps of each ky folded into K, bf16
    # b_ref: (Cout, 1)               conv bias, f32
    # o_ref: (1, TH, Cout, W)        output row tile, (H, C, W) layout, f32, W lane-dense
    _, th, cout, w_out = o_ref.shape
    base = pl.program_id(1) * th           # first output row of this tile (global row index)

    def row_body(r, carry):
        # (Cout, W) f32 accumulator: a handful of vregs -> stays register resident across taps.
        acc = jnp.zeros((cout, w_out), jnp.float32)
        for ky in range(KH):                # static: 7 deep MXU dots per output row
            slab = x_ref[0, base + r + ky, :, :]                    # (Cin_p, Wp) dense plane
            xs = jnp.concatenate(                                   # fold 7 kx taps into K
                [slab[:, kx:kx + w_out] for kx in range(KW)], axis=0)   # (KW*Cin_p, W)
            acc = acc + jnp.dot(w_ref[ky], xs,
                                preferred_element_type=jnp.float32)     # (Cout, W)
        y = jnp.tanh(acc + b_ref[...])                              # fused bias + tanh (f32)
        o_ref[0, r, :, :] = y.astype(o_ref.dtype)
        return carry

    lax.fori_loop(0, th, row_body, None)


# ------------------------------- wrapper --------------------------------------
def _vmem_limit_bytes():
    try:
        kind = jax.devices()[0].device_kind.lower()
    except Exception:
        kind = ""
    if "v5" in kind or "v6" in kind:
        return 96 * 1024 * 1024     # 128 MiB physical: raise the default scoped limit
    if "7" in kind:
        return 48 * 1024 * 1024     # v7x: 64 MiB physical, leave double-buffer headroom
    return 64 * 1024 * 1024


def outconv_pallas(x_nchw, w, b, *, tile_h=32):
    """x_nchw: [N, Cin, H, W]; w: [Cout, Cin, 7, 7]; b: [Cout]. Returns [N, Cout, H, W] f32."""
    N, Cin, H, W = x_nchw.shape
    Cout = w.shape[0]
    Cin_p = ((Cin + CIN_ALIGN - 1) // CIN_ALIGN) * CIN_ALIGN

    th = min(tile_h, H)
    n_t = pl.cdiv(H, th)
    rows_total = n_t * th                      # ragged last tile -> pad rows, slice after
    Hp_tot, Wp = rows_total + 2 * PAD, W + 2 * PAD

    # --- input: reflect-pad, relayout to (N, H, C, W)  [W on lanes, C on sublanes], bf16 ---
    xp = jnp.pad(x_nchw, ((0, 0), (0, 0), (PAD, PAD), (PAD, PAD)), mode="reflect")
    xp = jnp.transpose(xp, (0, 2, 1, 3))                               # (N, Hp, Cin, Wp)
    xp = jnp.pad(xp, ((0, 0), (0, rows_total - H), (0, Cin_p - Cin), (0, 0)))
    xp = xp.astype(jnp.bfloat16)

    # --- weights: [Cout, Cin, 7, 7] -> (KH, Cout, KW*Cin_p), kx taps folded into K; bias f32 ---
    wk = jnp.pad(w, ((0, 0), (0, Cin_p - Cin), (0, 0), (0, 0)))
    wk = jnp.transpose(wk, (2, 0, 3, 1)).reshape(KH, Cout, KW * Cin_p).astype(jnp.bfloat16)
    bias = b.reshape(Cout, 1).astype(jnp.float32)

    grid = (N, n_t)
    out = pl.pallas_call(
        outconv_kernel,
        out_shape=jax.ShapeDtypeStruct((N, rows_total, Cout, W), jnp.float32),
        grid_spec=pltpu.PrefetchScalarGridSpec(
            num_scalar_prefetch=0,
            grid=grid,
            in_specs=[
                # whole padded image per batch; same block index across row tiles -> no re-DMA
                pl.BlockSpec((1, Hp_tot, Cin_p, Wp), lambda n, t: (n, 0, 0, 0)),
                pl.BlockSpec((KH, Cout, KW * Cin_p), lambda n, t: (0, 0, 0)),
                pl.BlockSpec((Cout, 1), lambda n, t: (0, 0)),
            ],
            out_specs=pl.BlockSpec((1, th, Cout, W), lambda n, t: (n, t, 0, 0)),
        ),
        compiler_params=pltpu.CompilerParams(
            # batch across TCs (v7x megacore); row tiles sequential on one core so the
            # VMEM-resident padded image is not duplicated per core.
            dimension_semantics=("parallel", "arbitrary"),
            vmem_limit_bytes=_vmem_limit_bytes(),
        ),
    )(xp, wk, bias)

    if rows_total != H:
        out = out[:, :H]
    return jnp.transpose(out, (0, 2, 1, 3))                            # -> NCHW


# --------------------------- pure-JAX reference --------------------------------
def outconv_reference(x_nchw, w, b):
    xpad = jnp.pad(x_nchw, ((0, 0), (0, 0), (PAD, PAD), (PAD, PAD)), mode="reflect")
    y = jax.lax.conv_general_dilated(
        xpad, w, window_strides=(1, 1), padding="VALID",
        dimension_numbers=("NCHW", "OIHW", "NCHW"))
    return jnp.tanh(y + b[None, :, None, None])


# ---------------------------------- main ----------------------------------------
if __name__ == "__main__":
    key = jax.random.PRNGKey(0)
    k_x, k_w, k_b = jax.random.split(key, 3)

    N, Cin, Cout, H, W = 2, 4, 3, 16, 16

    x = jax.random.normal(k_x, (N, Cin, H, W), jnp.float32)
    # Conv2d weight [out_ch, in_ch, kH, kW] and bias [out_ch]
    w = jax.random.normal(k_w, (Cout, Cin, KH, KW), jnp.float32) * 0.08
    b = 0.1 * jax.random.normal(k_b, (Cout,), jnp.float32)

    out = outconv_pallas(x, w, b)
    out = jax.block_until_ready(out)

    ref = outconv_reference(x, w, b)
    assert out.shape == (N, Cout, H, W), out.shape
    # bf16 operands in the kernel -> loosened tolerance (tanh output is in [-1, 1])
    assert jnp.allclose(out, ref, atol=5e-2, rtol=0.0), float(jnp.max(jnp.abs(out - ref)))

    print("KERNEL_OK")
</pallas_src>

<mosaic_0001>
module attributes {stable_mosaic.version = 11 : i64} {
  func.func @outconv_kernel(%arg0: i32, %arg1: i32, %arg2: memref<1x22x16x22xbf16, #tpu.memory_space<vmem>>, %arg3: memref<7x3x112xbf16, #tpu.memory_space<vmem>>, %arg4: memref<3x1xf32, #tpu.memory_space<vmem>>, %arg5: memref<1x16x3x16xf32, #tpu.memory_space<vmem>>) attributes {dimension_semantics = [#tpu.dimension_semantics<parallel>, #tpu.dimension_semantics<arbitrary>], iteration_bounds = array<i64: 2, 1>, scalar_prefetch = 0 : i64, scratch_operands = 0 : i64, tpu.core_type = #tpu.core_type<tc>, window_params = [{transform_indices = @transform_0, window_bounds = array<i64: 1, 22, 16, 22>}, {pipeline_mode = #tpu.pipeline_mode<synchronous>, transform_indices = @transform_1, window_bounds = array<i64: 7, 3, 112>}, {pipeline_mode = #tpu.pipeline_mode<synchronous>, transform_indices = @transform_2, window_bounds = array<i64: 3, 1>}, {transform_indices = @transform_3, window_bounds = array<i64: 1, 16, 3, 16>}]} {
    %c16_i32 = arith.constant 16 : i32
    %0 = arith.muli %arg1, %c16_i32 : i32
    %c0_i32 = arith.constant 0 : i32
    %c16_i32_0 = arith.constant 16 : i32
    %1 = arith.addi %c0_i32, %c16_i32_0 : i32
    %c1_i32 = arith.constant 1 : i32
    scf.for %arg6 = %c0_i32 to %1 step %c1_i32  : i32 {
      %cst = arith.constant 0.000000e+00 : f32
      %2 = vector.broadcast %cst : f32 to vector<3x16xf32>
      %3 = arith.addi %0, %arg6 : i32
      %c0_i32_2 = arith.constant 0 : i32
      %4 = arith.addi %3, %c0_i32_2 : i32
      %c0 = arith.constant 0 : index
      %5 = arith.index_cast %4 : i32 to index
      %c0_3 = arith.constant 0 : index
      %c0_4 = arith.constant 0 : index
      %6 = vector.load %arg2[%c0, %5, %c0_3, %c0_4] : memref<1x22x16x22xbf16, #tpu.memory_space<vmem>>, vector<1x1x16x22xbf16>
      %7 = vector.shape_cast %6 : vector<1x1x16x22xbf16> to vector<16x22xbf16>
      %8 = vector.extract_strided_slice %7 {offsets = [0, 0], sizes = [16, 16], strides = [1, 1]} : vector<16x22xbf16> to vector<16x16xbf16>
      %9 = vector.extract_strided_slice %7 {offsets = [0, 1], sizes = [16, 16], strides = [1, 1]} : vector<16x22xbf16> to vector<16x16xbf16>
      %10 = vector.extract_strided_slice %7 {offsets = [0, 2], sizes = [16, 16], strides = [1, 1]} : vector<16x22xbf16> to vector<16x16xbf16>
      %11 = vector.extract_strided_slice %7 {offsets = [0, 3], sizes = [16, 16], strides = [1, 1]} : vector<16x22xbf16> to vector<16x16xbf16>
      %12 = vector.extract_strided_slice %7 {offsets = [0, 4], sizes = [16, 16], strides = [1, 1]} : vector<16x22xbf16> to vector<16x16xbf16>
      %13 = vector.extract_strided_slice %7 {offsets = [0, 5], sizes = [16, 16], strides = [1, 1]} : vector<16x22xbf16> to vector<16x16xbf16>
      %14 = vector.extract_strided_slice %7 {offsets = [0, 6], sizes = [16, 16], strides = [1, 1]} : vector<16x22xbf16> to vector<16x16xbf16>
      %15 = tpu.concatenate %8, %9, %10, %11, %12, %13, %14 in 0 : vector<16x16xbf16>, vector<16x16xbf16>, vector<16x16xbf16>, vector<16x16xbf16>, vector<16x16xbf16>, vector<16x16xbf16>, vector<16x16xbf16> -> vector<112x16xbf16>
      %c0_5 = arith.constant 0 : index
      %c0_6 = arith.constant 0 : index
      %c0_7 = arith.constant 0 : index
      %16 = vector.load %arg3[%c0_5, %c0_6, %c0_7] : memref<7x3x112xbf16, #tpu.memory_space<vmem>>, vector<1x3x112xbf16>
      %17 = vector.shape_cast %16 : vector<1x3x112xbf16> to vector<3x112xbf16>
      %cst_8 = arith.constant dense<0.000000e+00> : vector<3x16xf32>
      %18 = tpu.matmul %17, %15, %cst_8 {dimension_numbers = #tpu.dot_dimension_numbers<[1], [0], [0], [1], [0, 0, 1, 1], [], []>} : vector<3x112xbf16>, vector<112x16xbf16>, vector<3x16xf32> -> vector<3x16xf32>
      %19 = arith.addf %2, %18 : vector<3x16xf32>
      %20 = arith.addi %0, %arg6 : i32
      %c1_i32_9 = arith.constant 1 : i32
      %21 = arith.addi %20, %c1_i32_9 : i32
      %c0_10 = arith.constant 0 : index
      %22 = arith.index_cast %21 : i32 to index
      %c0_11 = arith.constant 0 : index
      %c0_12 = arith.constant 0 : index
      %23 = vector.load %arg2[%c0_10, %22, %c0_11, %c0_12] : memref<1x22x16x22xbf16, #tpu.memory_space<vmem>>, vector<1x1x16x22xbf16>
      %24 = vector.shape_cast %23 : vector<1x1x16x22xbf16> to vector<16x22xbf16>
      %25 = vector.extract_strided_slice %24 {offsets = [0, 0], sizes = [16, 16], strides = [1, 1]} : vector<16x22xbf16> to vector<16x16xbf16>
      %26 = vector.extract_strided_slice %24 {offsets = [0, 1], sizes = [16, 16], strides = [1, 1]} : vector<16x22xbf16> to vector<16x16xbf16>
      %27 = vector.extract_strided_slice %24 {offsets = [0, 2], sizes = [16, 16], strides = [1, 1]} : vector<16x22xbf16> to vector<16x16xbf16>
      %28 = vector.extract_strided_slice %24 {offsets = [0, 3], sizes = [16, 16], strides = [1, 1]} : vector<16x22xbf16> to vector<16x16xbf16>
      %29 = vector.extract_strided_slice %24 {offsets = [0, 4], sizes = [16, 16], strides = [1, 1]} : vector<16x22xbf16> to vector<16x16xbf16>
      %30 = vector.extract_strided_slice %24 {offsets = [0, 5], sizes = [16, 16], strides = [1, 1]} : vector<16x22xbf16> to vector<16x16xbf16>
      %31 = vector.extract_strided_slice %24 {offsets = [0, 6], sizes = [16, 16], strides = [1, 1]} : vector<16x22xbf16> to vector<16x16xbf16>
      %32 = tpu.concatenate %25, %26, %27, %28, %29, %30, %31 in 0 : vector<16x16xbf16>, vector<16x16xbf16>, vector<16x16xbf16>, vector<16x16xbf16>, vector<16x16xbf16>, vector<16x16xbf16>, vector<16x16xbf16> -> vector<112x16xbf16>
      %c1 = arith.constant 1 : index
      %c0_13 = arith.constant 0 : index
      %c0_14 = arith.constant 0 : index
      %33 = vector.load %arg3[%c1, %c0_13, %c0_14] : memref<7x3x112xbf16, #tpu.memory_space<vmem>>, vector<1x3x112xbf16>
      %34 = vector.shape_cast %33 : vector<1x3x112xbf16> to vector<3x112xbf16>
      %cst_15 = arith.constant dense<0.000000e+00> : vector<3x16xf32>
      %35 = tpu.matmul %34, %32, %cst_15 {dimension_numbers = #tpu.dot_dimension_numbers<[1], [0], [0], [1], [0, 0, 1, 1], [], []>} : vector<3x112xbf16>, vector<112x16xbf16>, vector<3x16xf32> -> vector<3x16xf32>
      %36 = arith.addf %19, %35 : vector<3x16xf32>
      %37 = arith.addi %0, %arg6 : i32
      %c2_i32 = arith.constant 2 : i32
      %38 = arith.addi %37, %c2_i32 : i32
      %c0_16 = arith.constant 0 : index
      %39 = arith.index_cast %38 : i32 to index
      %c0_17 = arith.constant 0 : index
      %c0_18 = arith.constant 0 : index
      %40 = vector.load %arg2[%c0_16, %39, %c0_17, %c0_18] : memref<1x22x16x22xbf16, #tpu.memory_space<vmem>>, vector<1x1x16x22xbf16>
      %41 = vector.shape_cast %40 : vector<1x1x16x22xbf16> to vector<16x22xbf16>
      %42 = vector.extract_strided_slice %41 {offsets = [0, 0], sizes = [16, 16], strides = [1, 1]} : vector<16x22xbf16> to vector<16x16xbf16>
      %43 = vector.extract_strided_slice %41 {offsets = [0, 1], sizes = [16, 16], strides = [1, 1]} : vector<16x22xbf16> to vector<16x16xbf16>
      %44 = vector.extract_strided_slice %41 {offsets = [0, 2], sizes = [16, 16], strides = [1, 1]} : vector<16x22xbf16> to vector<16x16xbf16>
      %45 = vector.extract_strided_slice %41 {offsets = [0, 3], sizes = [16, 16], strides = [1, 1]} : vector<16x22xbf16> to vector<16x16xbf16>
      %46 = vector.extract_strided_slice %41 {offsets = [0, 4], sizes = [16, 16], strides = [1, 1]} : vector<16x22xbf16> to vector<16x16xbf16>
      %47 = vector.extract_strided_slice %41 {offsets = [0, 5], sizes = [16, 16], strides = [1, 1]} : vector<16x22xbf16> to vector<16x16xbf16>
      %48 = vector.extract_strided_slice %41 {offsets = [0, 6], sizes = [16, 16], strides = [1, 1]} : vector<16x22xbf16> to vector<16x16xbf16>
      %49 = tpu.concatenate %42, %43, %44, %45, %46, %47, %48 in 0 : vector<16x16xbf16>, vector<16x16xbf16>, vector<16x16xbf16>, vector<16x16xbf16>, vector<16x16xbf16>, vector<16x16xbf16>, vector<16x16xbf16> -> vector<112x16xbf16>
      %c2 = arith.constant 2 : index
      %c0_19 = arith.constant 0 : index
      %c0_20 = arith.constant 0 : index
      %50 = vector.load %arg3[%c2, %c0_19, %c0_20] : memref<7x3x112xbf16, #tpu.memory_space<vmem>>, vector<1x3x112xbf16>
      %51 = vector.shape_cast %50 : vector<1x3x112xbf16> to vector<3x112xbf16>
      %cst_21 = arith.constant dense<0.000000e+00> : vector<3x16xf32>
      %52 = tpu.matmul %51, %49, %cst_21 {dimension_numbers = #tpu.dot_dimension_numbers<[1], [0], [0], [1], [0, 0, 1, 1], [], []>} : vector<3x112xbf16>, vector<112x16xbf16>, vector<3x16xf32> -> vector<3x16xf32>
      %53 = arith.addf %36, %52 : vector<3x16xf32>
      %54 = arith.addi %0, %arg6 : i32
      %c3_i32 = arith.constant 3 : i32
      %55 = arith.addi %54, %c3_i32 : i32
      %c0_22 = arith.constant 0 : index
      %56 = arith.index_cast %55 : i32 to index
      %c0_23 = arith.constant 0 : index
      %c0_24 = arith.constant 0 : index
      %57 = vector.load %arg2[%c0_22, %56, %c0_23, %c0_24] : memref<1x22x16x22xbf16, #tpu.memory_space<vmem>>, vector<1x1x16x22xbf16>
      %58 = vector.shape_cast %57 : vector<1x1x16x22xbf16> to vector<16x22xbf16>
      %59 = vector.extract_strided_slice %58 {offsets = [0, 0], sizes = [16, 16], strides = [1, 1]} : vector<16x22xbf16> to vector<16x16xbf16>
      %60 = vector.extract_strided_slice %58 {offsets = [0, 1], sizes = [16, 16], strides = [1, 1]} : vector<16x22xbf16> to vector<16x16xbf16>
      %61 = vector.extract_strided_slice %58 {offsets = [0, 2], sizes = [16, 16], strides = [1, 1]} : vector<16x22xbf16> to vector<16x16xbf16>
      %62 = vector.extract_strided_slice %58 {offsets = [0, 3], sizes = [16, 16], strides = [1, 1]} : vector<16x22xbf16> to vector<16x16xbf16>
      %63 = vector.extract_strided_slice %58 {offsets = [0, 4], sizes = [16, 16], strides = [1, 1]} : vector<16x22xbf16> to vector<16x16xbf16>
      %64 = vector.extract_strided_slice %58 {offsets = [0, 5], sizes = [16, 16], strides = [1, 1]} : vector<16x22xbf16> to vector<16x16xbf16>
      %65 = vector.extract_strided_slice %58 {offsets = [0, 6], sizes = [16, 16], strides = [1, 1]} : vector<16x22xbf16> to vector<16x16xbf16>
      %66 = tpu.concatenate %59, %60, %61, %62, %63, %64, %65 in 0 : vector<16x16xbf16>, vector<16x16xbf16>, vector<16x16xbf16>, vector<16x16xbf16>, vector<16x16xbf16>, vector<16x16xbf16>, vector<16x16xbf16> -> vector<112x16xbf16>
      %c3 = arith.constant 3 : index
      %c0_25 = arith.constant 0 : index
      %c0_26 = arith.constant 0 : index
      %67 = vector.load %arg3[%c3, %c0_25, %c0_26] : memref<7x3x112xbf16, #tpu.memory_space<vmem>>, vector<1x3x112xbf16>
      %68 = vector.shape_cast %67 : vector<1x3x112xbf16> to vector<3x112xbf16>
      %cst_27 = arith.constant dense<0.000000e+00> : vector<3x16xf32>
      %69 = tpu.matmul %68, %66, %cst_27 {dimension_numbers = #tpu.dot_dimension_numbers<[1], [0], [0], [1], [0, 0, 1, 1], [], []>} : vector<3x112xbf16>, vector<112x16xbf16>, vector<3x16xf32> -> vector<3x16xf32>
      %70 = arith.addf %53, %69 : vector<3x16xf32>
      %71 = arith.addi %0, %arg6 : i32
      %c4_i32 = arith.constant 4 : i32
      %72 = arith.addi %71, %c4_i32 : i32
      %c0_28 = arith.constant 0 : index
      %73 = arith.index_cast %72 : i32 to index
      %c0_29 = arith.constant 0 : index
      %c0_30 = arith.constant 0 : index
      %74 = vector.load %arg2[%c0_28, %73, %c0_29, %c0_30] : memref<1x22x16x22xbf16, #tpu.memory_space<vmem>>, vector<1x1x16x22xbf16>
      %75 = vector.shape_cast %74 : vector<1x1x16x22xbf16> to vector<16x22xbf16>
      %76 = vector.extract_strided_slice %75 {offsets = [0, 0], sizes = [16, 16], strides = [1, 1]} : vector<16x22xbf16> to vector<16x16xbf16>
      %77 = vector.extract_strided_slice %75 {offsets = [0, 1], sizes = [16, 16], strides = [1, 1]} : vector<16x22xbf16> to vector<16x16xbf16>
      %78 = vector.extract_strided_slice %75 {offsets = [0, 2], sizes = [16, 16], strides = [1, 1]} : vector<16x22xbf16> to vector<16x16xbf16>
      %79 = vector.extract_strided_slice %75 {offsets = [0, 3], sizes = [16, 16], strides = [1, 1]} : vector<16x22xbf16> to vector<16x16xbf16>
      %80 = vector.extract_strided_slice %75 {offsets = [0, 4], sizes = [16, 16], strides = [1, 1]} : vector<16x22xbf16> to vector<16x16xbf16>
      %81 = vector.extract_strided_slice %75 {offsets = [0, 5], sizes = [16, 16], strides = [1, 1]} : vector<16x22xbf16> to vector<16x16xbf16>
      %82 = vector.extract_strided_slice %75 {offsets = [0, 6], sizes = [16, 16], strides = [1, 1]} : vector<16x22xbf16> to vector<16x16xbf16>
      %83 = tpu.concatenate %76, %77, %78, %79, %80, %81, %82 in 0 : vector<16x16xbf16>, vector<16x16xbf16>, vector<16x16xbf16>, vector<16x16xbf16>, vector<16x16xbf16>, vector<16x16xbf16>, vector<16x16xbf16> -> vector<112x16xbf16>
      %c4 = arith.constant 4 : index
      %c0_31 = arith.constant 0 : index
      %c0_32 = arith.constant 0 : index
      %84 = vector.load %arg3[%c4, %c0_31, %c0_32] : memref<7x3x112xbf16, #tpu.memory_space<vmem>>, vector<1x3x112xbf16>
      %85 = vector.shape_cast %84 : vector<1x3x112xbf16> to vector<3x112xbf16>
      %cst_33 = arith.constant dense<0.000000e+00> : vector<3x16xf32>
      %86 = tpu.matmul %85, %83, %cst_33 {dimension_numbers = #tpu.dot_dimension_numbers<[1], [0], [0], [1], [0, 0, 1, 1], [], []>} : vector<3x112xbf16>, vector<112x16xbf16>, vector<3x16xf32> -> vector<3x16xf32>
      %87 = arith.addf %70, %86 : vector<3x16xf32>
      %88 = arith.addi %0, %arg6 : i32
      %c5_i32 = arith.constant 5 : i32
      %89 = arith.addi %88, %c5_i32 : i32
      %c0_34 = arith.constant 0 : index
      %90 = arith.index_cast %89 : i32 to index
      %c0_35 = arith.constant 0 : index
      %c0_36 = arith.constant 0 : index
      %91 = vector.load %arg2[%c0_34, %90, %c0_35, %c0_36] : memref<1x22x16x22xbf16, #tpu.memory_space<vmem>>, vector<1x1x16x22xbf16>
      %92 = vector.shape_cast %91 : vector<1x1x16x22xbf16> to vector<16x22xbf16>
      %93 = vector.extract_strided_slice %92 {offsets = [0, 0], sizes = [16, 16], strides = [1, 1]} : vector<16x22xbf16> to vector<16x16xbf16>
      %94 = vector.extract_strided_slice %92 {offsets = [0, 1], sizes = [16, 16], strides = [1, 1]} : vector<16x22xbf16> to vector<16x16xbf16>
      %95 = vector.extract_strided_slice %92 {offsets = [0, 2], sizes = [16, 16], strides = [1, 1]} : vector<16x22xbf16> to vector<16x16xbf16>
      %96 = vector.extract_strided_slice %92 {offsets = [0, 3], sizes = [16, 16], strides = [1, 1]} : vector<16x22xbf16> to vector<16x16xbf16>
      %97 = vector.extract_strided_slice %92 {offsets = [0, 4], sizes = [16, 16], strides = [1, 1]} : vector<16x22xbf16> to vector<16x16xbf16>
      %98 = vector.extract_strided_slice %92 {offsets = [0, 5], sizes = [16, 16], strides = [1, 1]} : vector<16x22xbf16> to vector<16x16xbf16>
      %99 = vector.extract_strided_slice %92 {offsets = [0, 6], sizes = [16, 16], strides = [1, 1]} : vector<16x22xbf16> to vector<16x16xbf16>
      %100 = tpu.concatenate %93, %94, %95, %96, %97, %98, %99 in 0 : vector<16x16xbf16>, vector<16x16xbf16>, vector<16x16xbf16>, vector<16x16xbf16>, vector<16x16xbf16>, vector<16x16xbf16>, vector<16x16xbf16> -> vector<112x16xbf16>
      %c5 = arith.constant 5 : index
      %c0_37 = arith.constant 0 : index
      %c0_38 = arith.constant 0 : index
      %101 = vector.load %arg3[%c5, %c0_37, %c0_38] : memref<7x3x112xbf16, #tpu.memory_space<vmem>>, vector<1x3x112xbf16>
      %102 = vector.shape_cast %101 : vector<1x3x112xbf16> to vector<3x112xbf16>
      %cst_39 = arith.constant dense<0.000000e+00> : vector<3x16xf32>
      %103 = tpu.matmul %102, %100, %cst_39 {dimension_numbers = #tpu.dot_dimension_numbers<[1], [0], [0], [1], [0, 0, 1, 1], [], []>} : vector<3x112xbf16>, vector<112x16xbf16>, vector<3x16xf32> -> vector<3x16xf32>
      %104 = arith.addf %87, %103 : vector<3x16xf32>
      %105 = arith.addi %0, %arg6 : i32
      %c6_i32 = arith.constant 6 : i32
      %106 = arith.addi %105, %c6_i32 : i32
      %c0_40 = arith.constant 0 : index
      %107 = arith.index_cast %106 : i32 to index
      %c0_41 = arith.constant 0 : index
      %c0_42 = arith.constant 0 : index
      %108 = vector.load %arg2[%c0_40, %107, %c0_41, %c0_42] : memref<1x22x16x22xbf16, #tpu.memory_space<vmem>>, vector<1x1x16x22xbf16>
      %109 = vector.shape_cast %108 : vector<1x1x16x22xbf16> to vector<16x22xbf16>
      %110 = vector.extract_strided_slice %109 {offsets = [0, 0], sizes = [16, 16], strides = [1, 1]} : vector<16x22xbf16> to vector<16x16xbf16>
      %111 = vector.extract_strided_slice %109 {offsets = [0, 1], sizes = [16, 16], strides = [1, 1]} : vector<16x22xbf16> to vector<16x16xbf16>
      %112 = vector.extract_strided_slice %109 {offsets = [0, 2], sizes = [16, 16], strides = [1, 1]} : vector<16x22xbf16> to vector<16x16xbf16>
      %113 = vector.extract_strided_slice %109 {offsets = [0, 3], sizes = [16, 16], strides = [1, 1]} : vector<16x22xbf16> to vector<16x16xbf16>
      %114 = vector.extract_strided_slice %109 {offsets = [0, 4], sizes = [16, 16], strides = [1, 1]} : vector<16x22xbf16> to vector<16x16xbf16>
      %115 = vector.extract_strided_slice %109 {offsets = [0, 5], sizes = [16, 16], strides = [1, 1]} : vector<16x22xbf16> to vector<16x16xbf16>
      %116 = vector.extract_strided_slice %109 {offsets = [0, 6], sizes = [16, 16], strides = [1, 1]} : vector<16x22xbf16> to vector<16x16xbf16>
      %117 = tpu.concatenate %110, %111, %112, %113, %114, %115, %116 in 0 : vector<16x16xbf16>, vector<16x16xbf16>, vector<16x16xbf16>, vector<16x16xbf16>, vector<16x16xbf16>, vector<16x16xbf16>, vector<16x16xbf16> -> vector<112x16xbf16>
      %c6 = arith.constant 6 : index
      %c0_43 = arith.constant 0 : index
      %c0_44 = arith.constant 0 : index
      %118 = vector.load %arg3[%c6, %c0_43, %c0_44] : memref<7x3x112xbf16, #tpu.memory_space<vmem>>, vector<1x3x112xbf16>
      %119 = vector.shape_cast %118 : vector<1x3x112xbf16> to vector<3x112xbf16>
      %cst_45 = arith.constant dense<0.000000e+00> : vector<3x16xf32>
      %120 = tpu.matmul %119, %117, %cst_45 {dimension_numbers = #tpu.dot_dimension_numbers<[1], [0], [0], [1], [0, 0, 1, 1], [], []>} : vector<3x112xbf16>, vector<112x16xbf16>, vector<3x16xf32> -> vector<3x16xf32>
      %121 = arith.addf %104, %120 : vector<3x16xf32>
      %c0_46 = arith.constant 0 : index
      %c0_47 = arith.constant 0 : index
      %122 = vector.load %arg4[%c0_46, %c0_47] : memref<3x1xf32, #tpu.memory_space<vmem>>, vector<3x1xf32>
      %123 = vector.broadcast %122 : vector<3x1xf32> to vector<3x16xf32>
      %124 = arith.addf %121, %123 : vector<3x16xf32>
      %125 = math.tanh %124 : vector<3x16xf32>
      %c0_48 = arith.constant 0 : index
      %126 = arith.index_cast %arg6 : i32 to index
      %c0_49 = arith.constant 0 : index
      %c0_50 = arith.constant 0 : index
      %127 = vector.load %arg5[%c0_48, %126, %c0_49, %c0_50] : memref<1x16x3x16xf32, #tpu.memory_space<vmem>>, vector<1x1x3x16xf32>
      %128 = vector.shape_cast %127 : vector<1x1x3x16xf32> to vector<3x16xf32>
      %129 = vector.shape_cast %125 : vector<3x16xf32> to vector<1x1x3x16xf32>
      tpu.vector_store %arg5[%c0_48, %126, %c0_49, %c0_50], %129 {strides = array<i32>} : memref<1x16x3x16xf32, #tpu.memory_space<vmem>>, vector<1x1x3x16xf32>,
    }
    %c16_i32_1 = arith.constant 16 : i32
    return
  }
  func.func @transform_0(%arg0: i32, %arg1: i32) -> (i32, i32, i32, i32) {
    %c0_i32 = arith.constant 0 : i32
    %c0_i32_0 = arith.constant 0 : i32
    %c0_i32_1 = arith.constant 0 : i32
    %c0_i32_2 = arith.constant 0 : i32
    return %arg0, %c0_i32, %c0_i32_0, %c0_i32_1 : i32, i32, i32, i32
  }
  func.func @transform_1(%arg0: i32, %arg1: i32) -> (i32, i32, i32) {
    %c0_i32 = arith.constant 0 : i32
    %c0_i32_0 = arith.constant 0 : i32
    %c0_i32_1 = arith.constant 0 : i32
    %c0_i32_2 = arith.constant 0 : i32
    return %c0_i32, %c0_i32_0, %c0_i32_1 : i32, i32, i32
  }
  func.func @transform_2(%arg0: i32, %arg1: i32) -> (i32, i32) {
    %c0_i32 = arith.constant 0 : i32
    %c0_i32_0 = arith.constant 0 : i32
    %c0_i32_1 = arith.constant 0 : i32
    return %c0_i32, %c0_i32_0 : i32, i32
  }
  func.func @transform_3(%arg0: i32, %arg1: i32) -> (i32, i32, i32, i32) {
    %c0_i32 = arith.constant 0 : i32
    %c0_i32_0 = arith.constant 0 : i32
    %c0_i32_1 = arith.constant 0 : i32
    return %arg0, %arg1, %c0_i32, %c0_i32_0 : i32, i32, i32, i32
  }
}

</mosaic_0001>

<bundles_post_ra>
// kernel: tpu_custom_call.1
= control target key start
LH: loop header
LB: loop body
LE: loop exit
PB: predicated region body
PF: predicated region fallthrough
CT: control target
= control target key end

     0   :  { %8 = vsyncpa [#allocation3], 0  ;;  %s1953_s0 = inlined_call_operand.hbm [shape: bf16[2,22,16,22], index: 0, kind: input, shape index: {}]   ;;  %s1954_s1 = inlined_call_operand.hbm [shape: bf16[7,3,112], index: 1, kind: input, shape index: {}]   ;;  %s1955_s2 = inlined_call_operand.hbm [shape: f32[3,1], index: 2, kind: input, shape index: {}]   ;;  %s1956_s3 = inlined_call_operand.hbm [shape: f32[2,16,3,16], index: 3, kind: output, shape index: {}]  }
   0x1   :  { %10 = vsyncpa [#allocation3 + $0x1], 0 }
   0x2   :  { %11 = vsyncpa [#allocation6], 0 }
   0x3   :  { %12 = vsyncpa [#allocation4], 0 }
   0x4   :  { %14 = vsyncpa [#allocation4 + $0x1], 0  ;;  %s1516_s12 = smov 0   ;;  %s1518_s13 = smov 0  }
   0x5   :  { %s1520_s14 = smov 0   ;;  %s1522_s15 = smov 0  }
   0x6   :  { %s1524_s16 = smov 0   ;;  %s1526_s17 = smov 0  }
   0x7 LB: > { %s941_s18 = sadd.s32 4294967295, %s1471_s17   ;;  %s942_s19 = sadd.s32 4294967294, %s1471_s17   ;;  %s1471_s17 = sphi %s1526_s17, %s20_s17   ;;  %s1467_s16 = sphi %s1524_s16, %s1978_s16   ;;  %s1463_s15 = sphi %s1522_s15, %s1977_s15   ;;  %s1459_s14 = sphi %s1520_s14, %s1976_s14   ;;  %s1455_s13 = sphi %s1518_s13, %s1975_s13   ;;  %s1451_s12 = sphi %s1516_s12, %s1974_s12  }
   0x8   : > { %p52_p0 = scmp.ne.s32.totalorder %s1455_s13, %s1451_s12  ;;  %p1550_p1 = scmp.eq.s32.totalorder %s941_s18, 0 }
   0x9   : > { %p1554_p2 = scmp.eq.s32.totalorder %s941_s18, 1  ;;  %p126_p3 = scmp.eq.s32.totalorder %s942_s19, 1 }
   0xa   : > { %s1961_s20 = scalar_select %p1550_p1, 1, 0 }
   0xb   : > { %p1560_p4 = por %p1550_p1, %p52_p0  ;;  %p943_p5 = scmp.ge.s32.totalorder %s1471_s17, 1 }
   0xc   : > { %p1565_p6 = por %p126_p3, %p52_p0  ;;  %p133_p7 = scmp.lt.s32.totalorder %s1471_s17, 3 }
   0xd   : > { %s1963_s22 = scalar_select %p1560_p4, 1, 0 }
   0xe   : > { %s1964_s23 = scalar_select %p1565_p6, 1, 0 }
   0xf   : > { %p1570_p8 = pnand %p943_p5, %p133_p7  ;;  %s1477_s25 = smov [#allocation5]  }
  0x10   : > { %s145_s26 = sshll.u32 %s1477_s25, 4  ;;  %s1478_s28 = smov [#allocation7]   ;;  %s1574_s26 = int_to_ptr.vmem [resolvable:$true] %s145_s26 }
  0x11   : > { %p1191_p9 = pneg %p1570_p8  ;;  %s159_s29 = sshll.u32 %s1478_s28, 4  ;;  %s1585_s29 = int_to_ptr.vmem [resolvable:$true] %s159_s29 }
  0x12   : > { %s1295_s5 = scalar_lea.hbm %s1954_s1, 224 }
  0x13   : > { %p1581_p11 = pnand %p1191_p9, %p1550_p1  ;;  %p1296_p12 = scmp.ne.s32.totalorder %s1954_s1, %s1295_s5 }
  0x14   : > { %p1302_p5 = scmp.lt.u32.totalorder %s1295_s5, %s1954_s1 }
  0x15   : > { %p1297_p13 = pneg %p1581_p11 }
  0x17   : > { %p1298_p0 = pnand %p1297_p13, %p1296_p12 }
  0x19   : > { %p1299_p3 = pneg %p1298_p0 }
  0x1b   : > { %p1304_p7 = pnand %p1302_p5, %p1299_p3 }
  0x1d   : > { %1307 = shalt.err (!%p1304_p7)
}
  0x1e   : > { %s1308_s10 = scalar_lea.vmem %s1574_s26, 224  ;;  %p1316_p1 = scmp.lt.s32.totalorder %s1574_s26, %s1574_s26 }
  0x1f   : > { %p1309_p9 = scmp.ne.s32.totalorder %s1574_s26, %s1308_s10  ;;  %p1317_p12 = scmp.lt.s32.totalorder %s1308_s10, %s1308_s10 }
  0x21   : > { %p1311_p10 = pnand %p1309_p9, %p1297_p13  ;;  %p1318_p0 = por %p1317_p12, %p1316_p1 }
  0x23   : > { %p1312_p6 = pneg %p1311_p10 }
  0x25   : > { %p1319_p4 = pnand %p1318_p0, %p1312_p6 }
  0x27   : > { %1322 = shalt.err (!%p1319_p4)
}
  0x28   : > { %s1479_s11 = smov 32   ;;  %s1480_s18 = smov 2  }
  0x29   : > { %1194 = dma.hbm_to_vmem [thread:$0]  (!%p1581_p11), %s1954_s1, 224, %s1574_s26, [#allocation6], %s1479_s11, %s1479_s11, %s1480_s18  }
  0x2a   : > { %s1323_s4 = scalar_lea.hbm %s1955_s2, 64 }
  0x2b   : > { %p1324_p1 = scmp.ne.s32.totalorder %s1955_s2, %s1323_s4  ;;  %p1330_p10 = scmp.lt.u32.totalorder %s1323_s4, %s1955_s2 }
  0x2d   : > { %p1326_p4 = pnand %p1324_p1, %p1297_p13 }
  0x2f   : > { %p1327_p6 = pneg %p1326_p4 }
  0x31   : > { %p1332_p3 = pnand %p1330_p10, %p1327_p6 }
  0x33   : > { %1335 = shalt.err (!%p1332_p3)
}
  0x34   : > { %s1336_s26 = scalar_lea.vmem %s1585_s29, 64  ;;  %p1344_p12 = scmp.lt.s32.totalorder %s1585_s29, %s1585_s29 }
  0x35   : > { %p1337_p5 = scmp.ne.s32.totalorder %s1585_s29, %s1336_s26  ;;  %p1345_p0 = scmp.lt.s32.totalorder %s1336_s26, %s1336_s26 }
  0x37   : > { %p1339_p7 = pnand %p1337_p5, %p1297_p13  ;;  %p1346_p1 = por %p1345_p0, %p1344_p12 }
  0x39   : > { %p1340_p9 = pneg %p1339_p7 }
  0x3b   : > { %p1347_p4 = pnand %p1346_p1, %p1340_p9 }
  0x3d   : > { %1350 = shalt.err (!%p1347_p4)
}
  0x3e   : > { %1197 = dma.hbm_to_vmem [thread:$0]  (!%p1581_p11), %s1955_s2, 64, %s1585_s29, [#allocation6]  }
  0x3f   : > { %s32_s11 = sadd.s32 1, %s1467_s16  ;;  %s39_s18 = sadd.s32 1, %s1459_s14 }
  0x40   : > { %p34_p13 = scmp.ge.s32.totalorder %s32_s11, 2  ;;  %p46_p6 = scmp.ne.s32.totalorder %s1459_s14, %s1455_s13 }
  0x41   : > { %p47_p10 = scmp.eq.s32.totalorder %s1471_s17, 0  ;;  %p1208_p3 = scmp.lt.s32.totalorder %s1471_s17, 2 }
  0x42   : > { %s1980_s11 = smov (%p34_p13, %s32_s11), 0  ;;  %p1649_p7 = por %p1554_p2, %p46_p6 }
  0x43   : > { %p48_p5 = por %p47_p10, %p46_p6  ;;  %s36_s19 = ssub.s32 %s1467_s16, %s1980_s11 }
  0x44   : > { %s1967_s27 = scalar_select %p1649_p7, 1, 0 }
  0x45   : > { %s170_s25 = sand.u32 1, %s1459_s14   ;;  %p37_p9 = scmp.eq.s32.totalorder %s36_s19, 0 }
  0x46   : > { %s1176_s29 = smul.u32 176, %s170_s25  ;;  %p1656_p11 = pnand %p1208_p3, %p48_p5 }
  0x47   : > { %s1661_s30 = scalar_select %p37_p9, %s1459_s14, %s39_s18  }
  0x48   : > { %s1177_s4 = smul.u32 2816, %s1467_s16  ;;  %s174_s5 = scalar_lea.vmem [#allocation2], %s1176_s29 }
  0x49   : > { %s181_s6 = sshll.u32 %s174_s5, 4  ;;  %s1671_s26 = scalar_lea.sflag [#allocation3], %s170_s25  ;;  %s1669_s6 = int_to_ptr.vmem [resolvable:$true] %s181_s6 }
  0x4a   : > { %s1667_s8 = scalar_lea.hbm %s1953_s0, %s1177_s4  ;;  %p1353_p12 = pneg %p1656_p11 }
  0x4b   : > { %s1351_s9 = scalar_lea.hbm %s1667_s8, 2816  ;;  %s1356_s19 = scalar_lea.hbm %s1953_s0, 5632 }
  0x4c   : > { %p1352_p2 = scmp.ne.s32.totalorder %s1667_s8, %s1351_s9  ;;  %p1357_p4 = scmp.lt.u32.totalorder %s1667_s8, %s1953_s0 }
  0x4d   : > { %p1358_p13 = scmp.lt.u32.totalorder %s1356_s19, %s1351_s9  ;;  %p1360_p10 = scmp.lt.u32.totalorder %s1351_s9, %s1667_s8 }
  0x4e   : > { %p1354_p0 = pnand %p1353_p12, %p1352_p2 }
  0x4f   : > { %p1359_p6 = por %p1358_p13, %p1357_p4 }
  0x50   : > { %p1355_p1 = pneg %p1354_p0 }
  0x51   : > { %p1361_p3 = por %p1360_p10, %p1359_p6 }
  0x53   : > { %p1362_p5 = pnand %p1361_p3, %p1355_p1 }
  0x55   : > { %1365 = shalt.err (!%p1362_p5)
}
  0x56   : > { %s1366_s25 = scalar_lea.vmem %s1669_s6, 2816  ;;  %s1481_s5 = smov [#allocation2]  }
  0x57   : > { %p1367_p9 = scmp.ne.s32.totalorder %s1669_s6, %s1366_s25  ;;  %s1371_s21 = sshll.u32 %s1481_s5, 4  ;;  %s1372_s21 = int_to_ptr.vmem [resolvable:$false] %s1371_s21 }
  0x58   : > { %s1373_s7 = scalar_lea.vmem %s1372_s21, 5632  ;;  %p1374_p7 = scmp.lt.s32.totalorder %s1669_s6, %s1372_s21 }
  0x59   : > { %p1369_p2 = pnand %p1367_p9, %p1353_p12  ;;  %p1375_p4 = scmp.lt.s32.totalorder %s1373_s7, %s1366_s25 }
  0x5b   : > { %p1370_p0 = pneg %p1369_p2  ;;  %p1376_p13 = por %p1375_p4, %p1374_p7 }
  0x5d   : > { %p1377_p6 = pnand %p1376_p13, %p1370_p0 }
  0x5f   : > { %1380 = shalt.err (!%p1377_p6)
}
  0x60   : > { %s1482_s9 = smov 64   ;;  %s1483_s10 = smov 4  }
  0x61   : > { %1201 = dma.hbm_to_vmem [thread:$0]  (!%p1656_p11), %s1667_s8, 2816, %s1669_s6, %s1671_s26, %s1482_s9, %s1482_s9, %s1483_s10  }
  0x62   : > { %193 = sbr.rel (%p1570_p8) target bundleno = 578 (0x242), region = 32  ;;  %s1702_s18 = sand.u32 (!%p1570_p8), 1, %s1455_s13  }
  0x63   : > { %s1178_s19 = smul.u32 (!%p1570_p8), 176, %s1702_s18  ;;  %s196_s29 = scalar_lea.sflag (!%p1570_p8), [#allocation3], %s1702_s18 }
  0x64   : > { %p1969_p7 = scmp.ne.s32.totalorder (!%p1570_p8), %s1963_s22, 0 }
  0x65   : > { %s1706_s4 = scalar_lea.vmem (!%p1570_p8), [#allocation2], %s1178_s19 }
  0x69   : > { %1438 = dma.done.wait (%p1969_p7), %s196_s29, 2816  }
  0x6a   : > { %1440 = vsyncadd (%p1969_p7), %s196_s29, 4294964480  ;;  %p1970_p11 = scmp.ne.s32.totalorder %s1961_s20, 0 }
  0x6c   : > { %1442 = dma.done.wait (%p1970_p11), [#allocation6], 288  }
  0x6d   : > { %1444 = vsyncadd (%p1970_p11), [#allocation6], 4294967008  ;;  %s951_s24 = sshll.u32 %s1702_s18, 6  ;;  %s1719_s6 = smov 0  }
  0x6e   : > { %s1717_s28 = scalar_lea.vmem [#allocation8], %s951_s24 }
  0x6f LB: >> { %v1484_v0 = vmov 0.0   ;;  %s992_s20 = sshll.u32 %s1475_s6, 3  ;;  %s1485_s8 = smov 127   ;;  %vm1491_vm0 = vmmov 0   ;;  %v769_v8 = vld [vmem:[#allocation7] sm:$0x7]  ;;  %s1475_s6 = sphi %s1719_s6, %s238_s6  }
  0x70   : >> { %1050 = vmatprep.subr.bf16.mxu0 %v1484_v0  ;;  %1068 = vmatprep.subr.bf16.mxu1 %v1484_v0  ;;  %s1728_s22 = scalar_lea.vmem %s1706_s4, %s992_s20 [#allocation2]  ;;  %s1486_s26 = smov 125   ;;  %v1492_v9 = vmov 0   ;;  %v301_v22 = vld [vmem:[#allocation5 + $0x2] sm:$0x3]  ;;  %vm302_vm1 = vcmask 916480   ;;  %vm779_vm2 = vcmask 124928  }
  0x71   : >> { %v1286_v1 = vld [vmem:[%s1728_s22 + $0x8] sm:$0xff]   ;;  %v1287_v2 = vld [vmem:[%s1728_s22] sm:$0xff]   ;;  %s1487_s25 = smov 126   ;;  %s1488_s5 = smov 124   ;;  %v1741_v3 = vld [vmem:[%s1728_s22 + $0x10] sm:$0xff]   ;;  %1064 = vmatprep.mubr.msk.bf16.mxu0 %vm1491_vm0, %v1484_v0  ;;  %1082 = vmatprep.mubr.msk.bf16.mxu1 %vm1491_vm0, %v1484_v0 }
  0x72   : >> { %282 = vrot.lane.b32.xlu0 %v1286_v1, %s1485_s8  ;;  %288 = vrot.lane.b32.xlu1 %v1286_v1, %s1486_s26  ;;  %s1489_s21 = smov 123   ;;  %s1490_s7 = smov 122   ;;  %v1764_v4 = vld [vmem:[%s1728_s22 + $0x18] sm:$0xff]   ;;  %v1769_v5 = vld [vmem:[%s1728_s22 + $0x20] sm:$0xff]   ;;  %v572_v49 = vld [vmem:[#allocation5 + $0x8] sm:$0x3] }
  0x73   : >> { %1051 = vmatpush3.bf16.msra.mxu0 %v1286_v1  ;;  %1069 = vmatpush3.bf16.msra.mxu1 %v1287_v2  ;;  %v1794_v6 = vld [vmem:[%s1728_s22 + $0x28] sm:$0xff]   ;;  %v1799_v7 = vld [vmem:[%s1728_s22 + $0x30] sm:$0xff]   ;;  %v269_v28 = vld [vmem:[#allocation5] sm:$0x3]  ;;  %s986_s9 = sshll.u32 %s1475_s6, 2  ;;  %s238_s6 = sadd.s32 1, %s1475_s6  }
  0x74   : >> { %1052 = vmatprep.subr.bf16.mxu0 %v1484_v0  ;;  %1070 = vmatprep.subr.bf16.mxu1 %v1484_v0  ;;  %v420_v36 = vld [vmem:[#allocation5 + $0x4] sm:$0x3]  ;;  %v496_v42 = vld [vmem:[#allocation5 + $0x6] sm:$0x3]  ;;  %v648_v54 = vld [vmem:[#allocation5 + $0xa] sm:$0x3]  ;;  %s778_s10 = scalar_lea.vmem %s1717_s28, %s986_s9 [#allocation8] }
  0x75   : >> { %1285 = vset.pattern.permute.xlu0 %v1492_v9  ;;  %v724_v58 = vld [vmem:[#allocation5 + $0xc] sm:$0x3]  ;;  %p235_p8 = scmp.ge.s32.totalorder %s238_s6, 16  }
  0x76   : >> { %285 = vrot.lane.b32.xlu0 %v1286_v1, %s1487_s25  ;;  %291 = vrot.lane.b32.xlu1 %v1286_v1, %s1488_s5  ;;  %s993_s19 = sshll.u32 (%p235_p8), %s1463_s15, 10  ;;  %s797_s22 = sshll.u32 (%p235_p8), %s1717_s28, 4  ;;  %s1904_s22 = int_to_ptr.vmem [resolvable:$true] %s797_s22 }
  0x77   : > { %s1901_s20 = scalar_lea.hbm (%p235_p8), %s1956_s3, %s993_s19  ;;  %p1971_p1 = scmp.ne.s32.totalorder (%p235_p8), %s1967_s27, 0 }
  0x78   : > { %s1493_s4 = smov (%p235_p8), [#allocation8]  }
  0x79   : > { %s1385_s6 = sshll.u32 (%p235_p8), %s1493_s4, 4  ;;  %s1386_s6 = int_to_ptr.vmem [resolvable:$false] %s1385_s6 }
  0x7a   : >> { %294 = vrot.lane.b32.xlu0 %v1286_v1, %s1489_s21  ;;  %297 = vrot.lane.b32.xlu1 %v1286_v1, %s1490_s7  ;;  %s1387_s15 = scalar_lea.vmem (%p235_p8), %s1386_s6, 2048  ;;  %p1388_p5 = scmp.lt.s32.totalorder (%p235_p8), %s1904_s22, %s1386_s6 }
  0x7e   : >> { %251 = vrot.lane.b32.xlu0 %v1287_v2, %s1485_s8  ;;  %401 = vrot.lane.b32.xlu1 %v1741_v3, %s1485_s8 }
  0x82   : >> { %254 = vrot.lane.b32.xlu0 %v1287_v2, %s1487_s25  ;;  %404 = vrot.lane.b32.xlu1 %v1741_v3, %s1487_s25 }
  0x86   : >> { %257 = vrot.lane.b32.xlu0 %v1287_v2, %s1486_s26  ;;  %407 = vrot.lane.b32.xlu1 %v1741_v3, %s1486_s26 }
  0x8a   : >> { %260 = vrot.lane.b32.xlu0 %v1287_v2, %s1488_s5  ;;  %410 = vrot.lane.b32.xlu1 %v1741_v3, %s1488_s5 }
  0x8e   : >> { %263 = vrot.lane.b32.xlu0 %v1287_v2, %s1489_s21  ;;  %413 = vrot.lane.b32.xlu1 %v1741_v3, %s1489_s21 }
  0x92   : >> { %266 = vrot.lane.b32.xlu0 %v1287_v2, %s1490_s7  ;;  %416 = vrot.lane.b32.xlu1 %v1741_v3, %s1490_s7 }
  0x96   : >> { %477 = vrot.lane.b32.xlu0 %v1764_v4, %s1485_s8  ;;  %553 = vrot.lane.b32.xlu1 %v1769_v5, %s1485_s8 }
  0x9a   : >> { %480 = vrot.lane.b32.xlu0 %v1764_v4, %s1487_s25  ;;  %556 = vrot.lane.b32.xlu1 %v1769_v5, %s1487_s25 }
  0x9e   : >> { %483 = vrot.lane.b32.xlu0 %v1764_v4, %s1486_s26  ;;  %559 = vrot.lane.b32.xlu1 %v1769_v5, %s1486_s26 }
  0xa2   : >> { %486 = vrot.lane.b32.xlu0 %v1764_v4, %s1488_s5  ;;  %562 = vrot.lane.b32.xlu1 %v1769_v5, %s1488_s5 }
  0xa6   : >> { %489 = vrot.lane.b32.xlu0 %v1764_v4, %s1489_s21  ;;  %565 = vrot.lane.b32.xlu1 %v1769_v5, %s1489_s21 }
  0xaa   : >> { %492 = vrot.lane.b32.xlu0 %v1764_v4, %s1490_s7  ;;  %568 = vrot.lane.b32.xlu1 %v1769_v5, %s1490_s7 }
  0xae   : >> { %629 = vrot.lane.b32.xlu0 %v1794_v6, %s1485_s8  ;;  %705 = vrot.lane.b32.xlu1 %v1799_v7, %s1485_s8  ;;  %s782_s8 = scalar_lea.sflag (%p235_p8), [#allocation4], %s1702_s18 }
  0xb2   : >> { %632 = vrot.lane.b32.xlu0 %v1794_v6, %s1487_s25  ;;  %708 = vrot.lane.b32.xlu1 %v1799_v7, %s1487_s25 }
  0xb6   : >> { %635 = vrot.lane.b32.xlu0 %v1794_v6, %s1486_s26  ;;  %711 = vrot.lane.b32.xlu1 %v1799_v7, %s1486_s26  ;;  %s1381_s26 = scalar_lea.vmem (%p235_p8), %s1904_s22, 1024 }
  0xb7   : > { %p1382_p12 = scmp.ne.s32.totalorder (%p235_p8), %s1904_s22, %s1381_s26  ;;  %p1389_p9 = scmp.lt.s32.totalorder (%p235_p8), %s1387_s15, %s1381_s26 }
  0xb9   : > { %p1383_p10 = pnand (%p235_p8), %p1382_p12, %p1971_p1  ;;  %p1390_p2 = por (%p235_p8), %p1389_p9, %p1388_p5 }
  0xba   : >> { %638 = vrot.lane.b32.xlu0 %v1794_v6, %s1488_s5  ;;  %714 = vrot.lane.b32.xlu1 %v1799_v7, %s1488_s5 }
  0xbb   : > { %p1384_p3 = pneg (%p235_p8), %p1383_p10 }
  0xbd   : > { %p1391_p0 = pnand (%p235_p8), %p1390_p2, %p1384_p3 }
  0xbe   : >> { %641 = vrot.lane.b32.xlu0 %v1794_v6, %s1489_s21  ;;  %717 = vrot.lane.b32.xlu1 %v1799_v7, %s1489_s21 }
  0xc2   : >> { %644 = vrot.lane.b32.xlu0 %v1794_v6, %s1490_s7  ;;  %720 = vrot.lane.b32.xlu1 %v1799_v7, %s1490_s7 }
  0xc6   : >> { %772 = vperm.xlu0 %1285, %v769_v8  }
  0xe4   : >> { %v283_v10 = vpop.permute.xlu0 %282  ;;  %v289_v11 = vpop.permute.xlu1 %288 }
  0xe5   : >> { %1053 = vmatpush3.bf16.msra.mxu0 %v283_v10 }
  0xe6   : >> { %1054 = vmatprep.subr.bf16.mxu0 %v1484_v0 }
  0xe8   : >> { %v286_v12 = vpop.permute.xlu0 %285  ;;  %v292_v13 = vpop.permute.xlu1 %291 }
  0xe9   : >> { %1055 = vmatpush3.bf16.msra.mxu0 %v286_v12 }
  0xea   : >> { %1056 = vmatprep.subr.bf16.mxu0 %v1484_v0 }
  0xec   : >> { %v295_v14 = vpop.permute.xlu0 %294  ;;  %v298_v15 = vpop.permute.xlu1 %297 }
  0xed   : >> { %1057 = vmatpush3.bf16.msra.mxu0 %v289_v11 }
  0xee   : >> { %1058 = vmatprep.subr.bf16.mxu0 %v1484_v0 }
  0xf0   : >> { %v252_v16 = vpop.permute.xlu0 %251  ;;  %v402_v17 = vpop.permute.xlu1 %401 }
  0xf1   : >> { %1059 = vmatpush3.bf16.msra.mxu0 %v292_v13  ;;  %1071 = vmatpush3.bf16.msra.mxu1 %v252_v16 }
  0xf2   : >> { %1060 = vmatprep.subr.bf16.mxu0 %v1484_v0  ;;  %1072 = vmatprep.subr.bf16.mxu1 %v1484_v0 }
  0xf4   : >> { %v255_v18 = vpop.permute.xlu0 %254  ;;  %v405_v19 = vpop.permute.xlu1 %404 }
  0xf5   : >> { %1061 = vmatpush3.bf16.msra.mxu0 %v295_v14  ;;  %1073 = vmatpush3.bf16.msra.mxu1 %v255_v18 }
  0xf6   : >> { %1062 = vmatprep.subr.bf16.mxu0 %v1484_v0  ;;  %1074 = vmatprep.subr.bf16.mxu1 %v1484_v0 }
  0xf8   : >> { %v258_v20 = vpop.permute.xlu0 %257  ;;  %v408_v21 = vpop.permute.xlu1 %407 }
  0xf9   : >> { %1063 = vmatpush3.bf16.msra.mxu0 %v298_v15  ;;  %1075 = vmatpush3.bf16.msra.mxu1 %v258_v20 }
  0xfa   : >> { %1086 = vmatprep.subr.bf16.mxu0 %v1484_v0  ;;  %1076 = vmatprep.subr.bf16.mxu1 %v1484_v0 }
  0xfc   : >> { %1065 = vmatmul.mubr.msk.bf16.vlgmr.msra.gmra.mrb[0].mxu0 %vm302_vm1, %v301_v22  ;;  %v261_v23 = vpop.permute.xlu0 %260  ;;  %v411_v24 = vpop.permute.xlu1 %410 }
  0xfd   : >> { %1077 = vmatpush3.bf16.msra.mxu1 %v261_v23  ;;  %1087 = vmatpush3.bf16.msra.mxu0 %v1741_v3 }
  0xfe   : >> { %1088 = vmatprep.subr.bf16.mxu0 %v1484_v0  ;;  %1078 = vmatprep.subr.bf16.mxu1 %v1484_v0 }
  0xff   : >> { %1100 = vmatprep.mubr.msk.bf16.mxu0 %vm1491_vm0, %v1484_v0 }
 0x100   : >> { %v264_v25 = vpop.permute.xlu0 %263  ;;  %v414_v26 = vpop.permute.xlu1 %413 }
 0x101   : >> { %1079 = vmatpush3.bf16.msra.mxu1 %v264_v25  ;;  %1089 = vmatpush3.bf16.msra.mxu0 %v402_v17 }
 0x102   : >> { %1090 = vmatprep.subr.bf16.mxu0 %v1484_v0  ;;  %1080 = vmatprep.subr.bf16.mxu1 %v1484_v0 }
 0x104   : >> { %v267_v27 = vpop.permute.xlu0 %266  ;;  %v417_v29 = vpop.permute.xlu1 %416 }
 0x105   : >> { %1081 = vmatpush3.bf16.msra.mxu1 %v267_v27  ;;  %1091 = vmatpush3.bf16.msra.mxu0 %v405_v19 }
 0x106   : >> { %1092 = vmatprep.subr.bf16.mxu0 %v1484_v0  ;;  %1104 = vmatprep.subr.bf16.mxu1 %v1484_v0 }
 0x108   : >> { %1083 = vmatmul.mubr.msk.bf16.vlgmr.msra.gmra.mrb[0].mxu1 %vm302_vm1, %v269_v28  ;;  %v478_v30 = vpop.permute.xlu0 %477  ;;  %v554_v31 = vpop.permute.xlu1 %553 }
 0x109   : >> { %1093 = vmatpush3.bf16.msra.mxu0 %v408_v21  ;;  %1105 = vmatpush3.bf16.msra.mxu1 %v1764_v4 }
 0x10a   : >> { %1094 = vmatprep.subr.bf16.mxu0 %v1484_v0  ;;  %1106 = vmatprep.subr.bf16.mxu1 %v1484_v0 }
 0x10b   : >> { %1118 = vmatprep.mubr.msk.bf16.mxu1 %vm1491_vm0, %v1484_v0 }
 0x10c   : >> { %v481_v32 = vpop.permute.xlu0 %480  ;;  %v557_v34 = vpop.permute.xlu1 %556 }
 0x10d   : >> { %1095 = vmatpush3.bf16.msra.mxu0 %v411_v24  ;;  %1107 = vmatpush3.bf16.msra.mxu1 %v478_v30 }
 0x10e   : >> { %1096 = vmatprep.subr.bf16.mxu0 %v1484_v0  ;;  %1108 = vmatprep.subr.bf16.mxu1 %v1484_v0 }
 0x110   : >> { %v484_v33 = vpop.permute.xlu0 %483  ;;  %v560_v37 = vpop.permute.xlu1 %559 }
 0x111   : >> { %1097 = vmatpush3.bf16.msra.mxu0 %v414_v26  ;;  %1109 = vmatpush3.bf16.msra.mxu1 %v481_v32 }
 0x112   : >> { %1098 = vmatprep.subr.bf16.mxu0 %v1484_v0  ;;  %1110 = vmatprep.subr.bf16.mxu1 %v1484_v0 }
 0x114   : >> { %v487_v35 = vpop.permute.xlu0 %486  ;;  %v563_v40 = vpop.permute.xlu1 %562 }
 0x115   : >> { %1099 = vmatpush3.bf16.msra.mxu0 %v417_v29  ;;  %1111 = vmatpush3.bf16.msra.mxu1 %v484_v33 }
 0x116   : >> { %1122 = vmatprep.subr.bf16.mxu0 %v1484_v0  ;;  %1112 = vmatprep.subr.bf16.mxu1 %v1484_v0 }
 0x118   : >> { %1101 = vmatmul.mubr.msk.bf16.vlgmr.msra.gmra.mrb[4].mxu0 %vm302_vm1, %v420_v36  ;;  %v490_v38 = vpop.permute.xlu0 %489  ;;  %v566_v43 = vpop.permute.xlu1 %565 }
 0x119   : >> { %1113 = vmatpush3.bf16.msra.mxu1 %v487_v35  ;;  %1123 = vmatpush3.bf16.msra.mxu0 %v1769_v5 }
 0x11a   : >> { %1124 = vmatprep.subr.bf16.mxu0 %v1484_v0  ;;  %1114 = vmatprep.subr.bf16.mxu1 %v1484_v0 }
 0x11b   : >> { %1136 = vmatprep.mubr.msk.bf16.mxu0 %vm1491_vm0, %v1484_v0 }
 0x11c   : >> { %v493_v39 = vpop.permute.xlu0 %492  ;;  %v569_v45 = vpop.permute.xlu1 %568 }
 0x11d   : >> { %1115 = vmatpush3.bf16.msra.mxu1 %v490_v38  ;;  %1125 = vmatpush3.bf16.msra.mxu0 %v554_v31 }
 0x11e   : >> { %1126 = vmatprep.subr.bf16.mxu0 %v1484_v0  ;;  %1116 = vmatprep.subr.bf16.mxu1 %v1484_v0 }
 0x120   : >> { %v630_v41 = vpop.permute.xlu0 %629  ;;  %v706_v47 = vpop.permute.xlu1 %705 }
 0x121   : >> { %1117 = vmatpush3.bf16.msra.mxu1 %v493_v39  ;;  %1127 = vmatpush3.bf16.msra.mxu0 %v557_v34 }
 0x122   : >> { %1128 = vmatprep.subr.bf16.mxu0 %v1484_v0  ;;  %1140 = vmatprep.subr.bf16.mxu1 %v1484_v0 }
 0x124   : >> { %1119 = vmatmul.mubr.msk.bf16.vlgmr.msra.gmra.mrb[4].mxu1 %vm302_vm1, %v496_v42  ;;  %v633_v44 = vpop.permute.xlu0 %632  ;;  %v709_v50 = vpop.permute.xlu1 %708 }
 0x125   : >> { %1129 = vmatpush3.bf16.msra.mxu0 %v560_v37  ;;  %1141 = vmatpush3.bf16.msra.mxu1 %v1794_v6 }
 0x126   : >> { %1130 = vmatprep.subr.bf16.mxu0 %v1484_v0  ;;  %1142 = vmatprep.subr.bf16.mxu1 %v1484_v0 }
 0x127   : >> { %1154 = vmatprep.mubr.msk.bf16.mxu1 %vm1491_vm0, %v1484_v0 }
 0x128   : >> { %v636_v46 = vpop.permute.xlu0 %635  ;;  %v712_v52 = vpop.permute.xlu1 %711 }
 0x129   : >> { %1131 = vmatpush3.bf16.msra.mxu0 %v563_v40  ;;  %1143 = vmatpush3.bf16.msra.mxu1 %v630_v41 }
 0x12a   : >> { %1132 = vmatprep.subr.bf16.mxu0 %v1484_v0  ;;  %1144 = vmatprep.subr.bf16.mxu1 %v1484_v0 }
 0x12c   : >> { %v639_v48 = vpop.permute.xlu0 %638  ;;  %v715_v55 = vpop.permute.xlu1 %714 }
 0x12d   : >> { %1133 = vmatpush3.bf16.msra.mxu0 %v566_v43  ;;  %1145 = vmatpush3.bf16.msra.mxu1 %v633_v44 }
 0x12e   : >> { %1134 = vmatprep.subr.bf16.mxu0 %v1484_v0  ;;  %1146 = vmatprep.subr.bf16.mxu1 %v1484_v0 }
 0x130   : >> { %v642_v51 = vpop.permute.xlu0 %641  ;;  %v718_v56 = vpop.permute.xlu1 %717 }
 0x131   : >> { %1135 = vmatpush3.bf16.msra.mxu0 %v569_v45  ;;  %1147 = vmatpush3.bf16.msra.mxu1 %v636_v46 }
 0x132   : >> { %1158 = vmatprep.subr.bf16.mxu0 %v1484_v0  ;;  %1148 = vmatprep.subr.bf16.mxu1 %v1484_v0 }
 0x134   : >> { %1137 = vmatmul.mubr.msk.bf16.vlgmr.msra.gmra.mrb[8].mxu0 %vm302_vm1, %v572_v49  ;;  %v645_v53 = vpop.permute.xlu0 %644  ;;  %v721_v57 = vpop.permute.xlu1 %720 }
 0x135   : >> { %1149 = vmatpush3.bf16.msra.mxu1 %v639_v48  ;;  %1159 = vmatpush3.bf16.msra.mxu0 %v1799_v7 }
 0x136   : >> { %1160 = vmatprep.subr.bf16.mxu0 %v1484_v0  ;;  %1150 = vmatprep.subr.bf16.mxu1 %v1484_v0 }
 0x137   : >> { %1172 = vmatprep.mubr.msk.bf16.mxu0 %vm1491_vm0, %v1484_v0 }
 0x139   : >> { %1151 = vmatpush3.bf16.msra.mxu1 %v642_v51  ;;  %1161 = vmatpush3.bf16.msra.mxu0 %v706_v47 }
 0x13a   : >> { %1162 = vmatprep.subr.bf16.mxu0 %v1484_v0  ;;  %1152 = vmatprep.subr.bf16.mxu1 %v1484_v0 }
 0x13d   : >> { %1153 = vmatpush3.bf16.msra.mxu1 %v645_v53  ;;  %1163 = vmatpush3.bf16.msra.mxu0 %v709_v50 }
 0x13e   : >> { %1164 = vmatprep.subr.bf16.mxu0 %v1484_v0 }
 0x140   : >> { %1155 = vmatmul.mubr.msk.bf16.vlgmr.msra.gmra.mrb[8].mxu1 %vm302_vm1, %v648_v54 }
 0x141   : >> { %1165 = vmatpush3.bf16.msra.mxu0 %v712_v52 }
 0x142   : >> { %1166 = vmatprep.subr.bf16.mxu0 %v1484_v0 }
 0x145   : >> { %1167 = vmatpush3.bf16.msra.mxu0 %v715_v55  ;;  %v773_v25 = vpop.permute.xlu0 %772 }
 0x146   : >> { %1168 = vmatprep.subr.bf16.mxu0 %v1484_v0 }
 0x149   : >> { %1169 = vmatpush3.bf16.msra.mxu0 %v718_v56 }
 0x14a   : >> { %1170 = vmatprep.subr.bf16.mxu0 %v1484_v0 }
 0x14d   : >> { %1171 = vmatpush3.bf16.msra.mxu0 %v721_v57 }
 0x150   : >> { %1173 = vmatmul.mubr.msk.bf16.vlgmr.msra.gmra.mrb[12].mxu0 %vm302_vm1, %v724_v58 }
 0x1cf   : >> { %v340_v59 = vpop.f32.mrb[0].mxu0 }
 0x1d0   : >> { %v1066_v60 = vpop.f32.mrb[1].mxu0 }
 0x1d1   : >> { %v343_v61 = vpop.f32.mrb[2].mxu0 }
 0x1d2   : >> { %v1067_v62 = vpop.f32.mrb[3].mxu0 }
 0x1db   : >> { %v383_v63 = vpop.f32.mrb[0].mxu1 }
 0x1dc   : >> { %v384_v1 = vadd.f32 %v383_v63, %v340_v59  ;;  %v1084_v2 = vpop.f32.mrb[1].mxu1 }
 0x1dd   : >> { %v386_v3 = vpop.f32.mrb[2].mxu1 }
 0x1de   : >> { %v1085_v4 = vpop.f32.mrb[3].mxu1 }
 0x1eb   : >> { %v458_v5 = vpop.f32.mrb[4].mxu0 }
 0x1ec   : >> { %v464_v6 = vadd.f32 %v458_v5, %v384_v1  ;;  %v1102_v7 = vpop.f32.mrb[5].mxu0 }
 0x1ed   : >> { %v461_v8 = vpop.f32.mrb[6].mxu0 }
 0x1ee   : >> { %v1103_v9 = vpop.f32.mrb[7].mxu0 }
 0x1f7   : >> { %v534_v10 = vpop.f32.mrb[4].mxu1 }
 0x1f8   : >> { %v540_v0 = vadd.f32 %v534_v10, %v464_v6  ;;  %v1120_v11 = vpop.f32.mrb[5].mxu1 }
 0x1f9   : >> { %v537_v12 = vpop.f32.mrb[6].mxu1 }
 0x1fa   : >> { %v1121_v13 = vpop.f32.mrb[7].mxu1 }
 0x207   : >> { %v610_v14 = vpop.f32.mrb[8].mxu0 }
 0x208   : >> { %v616_v15 = vadd.f32 %v610_v14, %v540_v0  ;;  %v1138_v16 = vpop.f32.mrb[9].mxu0 }
 0x209   : >> { %v613_v17 = vpop.f32.mrb[10].mxu0 }
 0x20a   : >> { %v1139_v18 = vpop.f32.mrb[11].mxu0 }
 0x213   : >> { %v686_v19 = vpop.f32.mrb[8].mxu1 }
 0x214   : >> { %v692_v20 = vadd.f32 %v686_v19, %v616_v15  ;;  %v1156_v21 = vpop.f32.mrb[9].mxu1 }
 0x215   : >> { %v689_v22 = vpop.f32.mrb[10].mxu1 }
 0x216   : >> { %v1157_v23 = vpop.f32.mrb[11].mxu1 }
 0x223   : >> { %v762_v24 = vpop.f32.mrb[12].mxu0 }
 0x224   : >> { %v768_v26 = vadd.f32 %v762_v24, %v692_v20  ;;  %v1174_v27 = vpop.f32.mrb[13].mxu0 }
 0x225   : >> { %v765_v28 = vpop.f32.mrb[14].mxu0 }
 0x226   : >> { %v775_v29 = vadd.f32 %v773_v25, %v768_v26  ;;  %v1175_v30 = vpop.f32.mrb[15].mxu0 }
 0x228   : >> { %1293 = vtanh.f32 %v775_v29 }
 0x22d   : > { %237 = sbr.rel (!%p235_p8) target bundleno = 111 (0x6f), region = 106 }
 0x232   : >> { %v1294_v31 = vpop.eup %1293 }
 0x233   : >> { %780 = vst.msk [vmem:[%s778_s10] sm:$0x7] %vm779_vm2, %v1294_v31 }
 0x234   : > { %1394 = shalt.err (!%p1391_p0)
}
 0x235   : > { %s1395_s28 = scalar_lea.hbm %s1901_s20, 1024  ;;  %s1399_s21 = scalar_lea.hbm %s1956_s3, 2048 }
 0x236   : > { %p1396_p4 = scmp.ne.s32.totalorder %s1901_s20, %s1395_s28  ;;  %p1400_p7 = scmp.lt.u32.totalorder %s1901_s20, %s1956_s3 }
 0x237   : > { %p1401_p11 = scmp.lt.u32.totalorder %s1399_s21, %s1395_s28  ;;  %p1403_p12 = scmp.lt.u32.totalorder %s1395_s28, %s1901_s20 }
 0x238   : > { %p1397_p13 = pnand %p1396_p4, %p1971_p1 }
 0x239   : > { %p1402_p8 = por %p1401_p11, %p1400_p7 }
 0x23a   : > { %p1398_p6 = pneg %p1397_p13 }
 0x23b   : > { %p1404_p10 = por %p1403_p12, %p1402_p8 }
 0x23d   : > { %p1405_p3 = pnand %p1404_p10, %p1398_p6 }
 0x23f   : > { %1408 = shalt.err (!%p1405_p3)
}
 0x240   : > { %s1494_s10 = smov 64   ;;  %s1495_s19 = smov 4  }
 0x241   : > { %1189 = dma.vmem_to_hbm [thread:$0]  (%p1971_p1), %s1904_s22, 1024, %s1901_s20, %s782_s8, %s1494_s10, %s1494_s10, %s1495_s19  }
 0x242 PF: > { %s812_s29 = sand.u32 1, %s1451_s12   ;;  %p1972_p5 = scmp.ne.s32.totalorder %s1964_s23, 0 }
 0x243   : > { %p1973_p9 = scmp.ge.s32.totalorder %s1471_s17, 2  ;;  %s813_s24 = scalar_lea.sflag [#allocation4], %s812_s29 }
 0x245   : > { %p1203_p2 = pnand %p1973_p9, %p1972_p5 }
 0x247   : > { %1446 = dma.done.wait (!%p1203_p2), %s813_s24, 1024  }
 0x248   : > { %1448 = vsyncadd (!%p1203_p2), %s813_s24, 4294966272  ;;  %s20_s17 = sadd.s32 1, %s1471_s17   ;;  %s1974_s12 = smov %s1455_s13 }
 0x249   : > { %p17_p0 = scmp.ge.s32.totalorder %s20_s17, 4   ;;  %s1975_s13 = smov %s1459_s14 }
 0x24a   : > { %s1976_s14 = smov %s1661_s30  ;;  %s1977_s15 = smov %s1467_s16 }
 0x24b   : > { %s1978_s16 = smov %s1980_s11  ;;  %19 = sbr.rel (!%p17_p0) target bundleno = 7 (0x7), region = 117 }
 0x252   :  { %818 = vsyncpa [#allocation3], 1 }
 0x253   :  { %820 = vsyncpa [#allocation3 + $0x1], 1 }
 0x254   :  { %821 = vsyncpa [#allocation6], 1 }
 0x255   :  { %822 = vsyncpa [#allocation4], 1 }
 0x256   :  { %824 = vsyncpa [#allocation4 + $0x1], 1 }

</bundles_post_ra>
